<compile_context>
chip_gen: v7x
topology: tpu7x:2x2x1
jax: 0.10.0
libtpu: 0.0.40
codegen_flags: <defaults>
</compile_context>

<pallas_src>
import jax
import jax.numpy as jnp
from jax.experimental import pallas as pl
from jax.experimental.pallas import tpu as pltpu


def _round_up(x, m):
    return ((x + m - 1) // m) * m


def _choose_tile(dim, max_tile, align):
    """Tile size: multiple of `align`, <= max_tile, with minimal padding waste."""
    padded = _round_up(dim, align)
    if padded <= max_tile:
        return padded
    n_blocks = pl.cdiv(padded, max_tile)
    return _round_up(pl.cdiv(padded, n_blocks), align)


def _matmul_kernel(x_ref, wt_ref, o_ref, acc_ref):
    # x_ref : (tm, tk) bf16    wt_ref: (tk, tn) bf16
    # o_ref : (tm, tn) f32     acc_ref: (tm, tn) f32 scratch (K-resident)
    @pl.when(pl.program_id(2) == 0)
    def _():
        acc_ref[...] = jnp.zeros_like(acc_ref)

    acc_ref[...] += jnp.dot(
        x_ref[...], wt_ref[...], preferred_element_type=jnp.float32
    )

    @pl.when(pl.program_id(2) == pl.num_programs(2) - 1)
    def _():
        o_ref[...] = acc_ref[...].astype(o_ref.dtype)


def weight_adapter_forward(x, weight_t, *, compute_dtype=jnp.bfloat16):
    """x: (B, D_in), weight_t: (D_in, D_out)  ->  (B, D_out) float32.

    weight_t is linear1.weight pre-transposed, i.e. shape (in_features, out_features).
    """
    B, D_in = x.shape
    D_in_w, D_out = weight_t.shape
    assert D_in == D_in_w, (D_in, D_in_w)

    x = x.astype(compute_dtype)
    weight_t = weight_t.astype(compute_dtype)

    # Tiny shapes: XLA's fused dot beats the pallas_call overhead.
    if B <= 8 and D_in <= 128 and D_out <= 128:
        return jnp.dot(x, weight_t, preferred_element_type=jnp.float32)

    # bf16 tiles: sublane align 16, lane align 128.
    tm = _choose_tile(B, 128, 16)
    tn = _choose_tile(D_out, 512, 128)
    tk = _choose_tile(D_in, 512, 128)

    Mp, Np, Kp = _round_up(B, tm), _round_up(D_out, tn), _round_up(D_in, tk)

    x_p = x if (Mp == B and Kp == D_in) else jnp.pad(
        x, ((0, Mp - B), (0, Kp - D_in)))
    w_p = weight_t if (Kp == D_in and Np == D_out) else jnp.pad(
        weight_t, ((0, Kp - D_in), (0, Np - D_out)))

    grid = (Mp // tm, Np // tn, Kp // tk)

    out = pl.pallas_call(
        _matmul_kernel,
        out_shape=jax.ShapeDtypeStruct((Mp, Np), jnp.float32),
        grid_spec=pltpu.PrefetchScalarGridSpec(
            num_scalar_prefetch=0,
            grid=grid,
            in_specs=[
                pl.BlockSpec((tm, tk), lambda i, j, k: (i, k)),
                pl.BlockSpec((tk, tn), lambda i, j, k: (k, j)),
            ],
            out_specs=pl.BlockSpec((tm, tn), lambda i, j, k: (i, j)),
            scratch_shapes=[pltpu.VMEM((tm, tn), jnp.float32)],
        ),
        compiler_params=pltpu.CompilerParams(
            dimension_semantics=("parallel", "parallel", "arbitrary"),
        ),
    )(x_p, w_p)

    return out[:B, :D_out]


def init_weight_adapter_params(key, cache_keys_shape):
    """nn.Linear(D_in, D_out, bias=False) default init; returns W^T (D_in, D_out)."""
    D_in, D_out = cache_keys_shape
    bound = 1.0 / (D_in ** 0.5)
    w = jax.random.uniform(
        key, (D_out, D_in), dtype=jnp.float32, minval=-bound, maxval=bound
    )
    return w.T  # (D_in, D_out)


if __name__ == "__main__":
    key = jax.random.PRNGKey(0)
    k_ck, k_x, k_w = jax.random.split(key, 3)

    # cache_keys: (D_in, D_out); x: (B, D_in).  Ragged sizes exercise the
    # padding path and the multi-step-K accumulator (grid K = 2 here).
    D_in, D_out = 640, 384
    B = 24

    cache_keys = jax.random.normal(k_ck, (D_in, D_out), dtype=jnp.float32)
    weight_t = init_weight_adapter_params(k_w, cache_keys.shape)  # (D_in, D_out)
    x = jax.random.normal(k_x, (B, D_in), dtype=jnp.float32)

    fwd = jax.jit(weight_adapter_forward)
    out = jax.block_until_ready(fwd(x, weight_t))

    # Reference: same bf16-input / f32-accumulate contraction in plain JAX.
    ref = jnp.dot(x.astype(jnp.bfloat16), weight_t.astype(jnp.bfloat16),
                  preferred_element_type=jnp.float32)
    assert out.shape == (B, D_out)
    max_err = float(jnp.max(jnp.abs(out - ref)))
    assert jnp.allclose(out, ref, atol=2e-2, rtol=2e-2), max_err

    print("KERNEL_OK")
</pallas_src>

<mosaic_0001>
module attributes {stable_mosaic.version = 11 : i64} {
  func.func @_matmul_kernel(%arg0: i32, %arg1: i32, %arg2: i32, %arg3: memref<32x384xbf16, #tpu.memory_space<vmem>>, %arg4: memref<384x384xbf16, #tpu.memory_space<vmem>>, %arg5: memref<32x384xf32, #tpu.memory_space<vmem>>, %arg6: memref<32x384xf32, #tpu.memory_space<vmem>>) attributes {dimension_semantics = [#tpu.dimension_semantics<parallel>, #tpu.dimension_semantics<parallel>, #tpu.dimension_semantics<arbitrary>], iteration_bounds = array<i64: 1, 1, 2>, scalar_prefetch = 0 : i64, scratch_operands = 1 : i64, tpu.core_type = #tpu.core_type<tc>, window_params = [{transform_indices = @transform_0, window_bounds = array<i64: 32, 384>}, {transform_indices = @transform_1, window_bounds = array<i64: 384, 384>}, {transform_indices = @transform_2, window_bounds = array<i64: 32, 384>}]} {
    %c0_i32 = arith.constant 0 : i32
    %0 = arith.cmpi eq, %arg2, %c0_i32 : i32
    %1 = arith.extui %0 : i1 to i32
    %c0_i32_0 = arith.constant 0 : i32
    %2 = arith.cmpi ne, %1, %c0_i32_0 : i32
    scf.if %2 {
      %cst_9 = arith.constant 0.000000e+00 : f32
      %12 = vector.broadcast %cst_9 : f32 to vector<32x384xf32>
      %c0_10 = arith.constant 0 : index
      %c0_11 = arith.constant 0 : index
      %13 = vector.load %arg6[%c0_10, %c0_11] : memref<32x384xf32, #tpu.memory_space<vmem>>, vector<32x384xf32>
      tpu.vector_store %arg6[%c0_10, %c0_11], %12 {strides = array<i32>} : memref<32x384xf32, #tpu.memory_space<vmem>>, vector<32x384xf32>,
    } else {
    }
    %c0 = arith.constant 0 : index
    %c0_1 = arith.constant 0 : index
    %3 = vector.load %arg6[%c0, %c0_1] : memref<32x384xf32, #tpu.memory_space<vmem>>, vector<32x384xf32>
    %c0_2 = arith.constant 0 : index
    %c0_3 = arith.constant 0 : index
    %4 = vector.load %arg3[%c0_2, %c0_3] : memref<32x384xbf16, #tpu.memory_space<vmem>>, vector<32x384xbf16>
    %c0_4 = arith.constant 0 : index
    %c0_5 = arith.constant 0 : index
    %5 = vector.load %arg4[%c0_4, %c0_5] : memref<384x384xbf16, #tpu.memory_space<vmem>>, vector<384x384xbf16>
    %cst = arith.constant dense<0.000000e+00> : vector<32x384xf32>
    %6 = tpu.matmul %4, %5, %cst {dimension_numbers = #tpu.dot_dimension_numbers<[1], [0], [0], [1], [0, 0, 1, 1], [], []>} : vector<32x384xbf16>, vector<384x384xbf16>, vector<32x384xf32> -> vector<32x384xf32>
    %7 = arith.addf %3, %6 : vector<32x384xf32>
    %c0_6 = arith.constant 0 : index
    %c0_7 = arith.constant 0 : index
    %8 = vector.load %arg6[%c0_6, %c0_7] : memref<32x384xf32, #tpu.memory_space<vmem>>, vector<32x384xf32>
    tpu.vector_store %arg6[%c0_6, %c0_7], %7 {strides = array<i32>} : memref<32x384xf32, #tpu.memory_space<vmem>>, vector<32x384xf32>,
    %c1_i32 = arith.constant 1 : i32
    %9 = arith.cmpi eq, %arg2, %c1_i32 : i32
    %10 = arith.extui %9 : i1 to i32
    %c0_i32_8 = arith.constant 0 : i32
    %11 = arith.cmpi ne, %10, %c0_i32_8 : i32
    scf.if %11 {
      %c0_9 = arith.constant 0 : index
      %c0_10 = arith.constant 0 : index
      %12 = vector.load %arg6[%c0_9, %c0_10] : memref<32x384xf32, #tpu.memory_space<vmem>>, vector<32x384xf32>
      %c0_11 = arith.constant 0 : index
      %c0_12 = arith.constant 0 : index
      %13 = vector.load %arg5[%c0_11, %c0_12] : memref<32x384xf32, #tpu.memory_space<vmem>>, vector<32x384xf32>
      tpu.vector_store %arg5[%c0_11, %c0_12], %12 {strides = array<i32>} : memref<32x384xf32, #tpu.memory_space<vmem>>, vector<32x384xf32>,
    } else {
    }
    return
  }
  func.func @transform_0(%arg0: i32, %arg1: i32, %arg2: i32) -> (i32, i32) {
    %c0_i32 = arith.constant 0 : i32
    return %arg0, %arg2 : i32, i32
  }
  func.func @transform_1(%arg0: i32, %arg1: i32, %arg2: i32) -> (i32, i32) {
    %c0_i32 = arith.constant 0 : i32
    return %arg2, %arg1 : i32, i32
  }
  func.func @transform_2(%arg0: i32, %arg1: i32, %arg2: i32) -> (i32, i32) {
    %c0_i32 = arith.constant 0 : i32
    return %arg0, %arg1 : i32, i32
  }
}

</mosaic_0001>

<bundles_post_ra>
// kernel: weight_adapter_forward.1
= control target key start
LH: loop header
LB: loop body
LE: loop exit
PB: predicated region body
PF: predicated region fallthrough
CT: control target
= control target key end

     0   :  { %s1559_s9 = smov 0   ;;  %s1561_s10 = smov 0   ;;  %s1754_s0 = inlined_call_operand.vmem [shape: bf16[32,768], index: 0, kind: input, shape index: {}]   ;;  %s1755_s1 = inlined_call_operand.vmem [shape: bf16[768,384], index: 1, kind: input, shape index: {}]   ;;  %s1756_s2 = inlined_call_operand.vmem [shape: f32[32,384], index: 2, kind: output, shape index: {}]  }
   0x1   :  { %s1563_s11 = smov 0   ;;  %s1565_s12 = smov 0  }
   0x2   :  { %s1567_s13 = smov 0  }
   0x3 LB: > { %s24_s14 = sadd.s32 1, %s1536_s12  ;;  %p47_p1 = scmp.ne.s32.totalorder %s1528_s10, %s1524_s9  ;;  %s1540_s13 = sphi %s1567_s13, %s12_s13   ;;  %s1536_s12 = sphi %s1565_s12, %s1760_s12   ;;  %s1532_s11 = sphi %s1563_s11, %s1759_s11   ;;  %s1528_s10 = sphi %s1561_s10, %s1758_s10   ;;  %s1524_s9 = sphi %s1559_s9, %s1757_s9  }
   0x4   : > { %p25_p0 = scmp.ge.s32.totalorder %s24_s14, 2  ;;  %p48_p2 = scmp.eq.s32.totalorder %s1540_s13, 0 }
   0x5   : > { %s40_s16 = sadd.s32 1, %s1528_s10  ;;  %p1190_p5 = scmp.ge.s32.totalorder %s1540_s13, 2 }
   0x6   : > { %s1762_s14 = smov (%p25_p0, %s24_s14), 0  ;;  %p49_p3 = por %p48_p2, %p47_p1 }
   0x7   : > { %s36_s15 = ssub.s32 %s1536_s12, %s1762_s14  ;;  %129 = sbr.rel (%p1190_p5) target bundleno = 23 (0x17), region = 16 }
   0x8   : > { %p38_p4 = scmp.eq.s32.totalorder %s36_s15, 0 }
   0xa   : > { %s1594_s17 = scalar_select %p38_p4, %s1528_s10, %s40_s16  }
   0xe   : > { %132 = sbr.rel (!%p49_p3) target bundleno = 23 (0x17), region = 20  ;;  %s134_s18 = sand.u32 (%p49_p3), 1, %s1528_s10  }
   0xf   : > { %s1286_s19 = smul.u32 (%p49_p3), 12, %s1536_s12 }
  0x10   : > { %s1353_s20 = smul.u32 (%p49_p3), 48, %s134_s18 }
  0x11   : > { %s142_s23 = scalar_lea.vmem (%p49_p3), %s1754_s0, %s1286_s19 }
  0x12   : > { %v157_v0 = vld [vmem:[%s142_s23] sm:$0xff] (%p49_p3)  ;;  %v159_v1 = vld [vmem:[%s142_s23 + $0x18] sm:$0xff] (%p49_p3)  ;;  %v161_v2 = vld [vmem:[%s142_s23 + $0x30] sm:$0xff] (%p49_p3)  ;;  %s136_s24 = scalar_lea.vmem (%p49_p3), [#allocation3], %s1353_s20 }
  0x13   : > { %158 = vst [vmem:[%s136_s24] sm:$0xff] (%p49_p3), %v157_v0  ;;  %160 = vst [vmem:[%s136_s24 + $0xc] sm:$0xff] (%p49_p3), %v159_v1  ;;  %v163_v3 = vld [vmem:[%s142_s23 + $0x48] sm:$0xff] (%p49_p3)  ;;  %v1194_v5 = vld [vmem:[%s142_s23 + $0x20] sm:$0xf] (%p49_p3) }
  0x14   : > { %162 = vst [vmem:[%s136_s24 + $0x18] sm:$0xff] (%p49_p3), %v161_v2  ;;  %v1192_v4 = vld [vmem:[%s142_s23 + $0x8] sm:$0xf] (%p49_p3)  ;;  %164 = vst [vmem:[%s136_s24 + $0x24] sm:$0xff] (%p49_p3), %v163_v3  ;;  %v1196_v6 = vld [vmem:[%s142_s23 + $0x38] sm:$0xf] (%p49_p3) }
  0x15   : > { %1193 = vst [vmem:[%s136_s24 + $0x8] sm:$0xf] %v1192_v4  ;;  %1195 = vst [vmem:[%s136_s24 + $0x14] sm:$0xf] %v1194_v5  ;;  %v1198_v7 = vld [vmem:[%s142_s23 + $0x50] sm:$0xf] }
  0x16   : > { %1197 = vst [vmem:[%s136_s24 + $0x20] sm:$0xf] %v1196_v6  ;;  %1199 = vst [vmem:[%s136_s24 + $0x2c] sm:$0xf] %v1198_v7 }
  0x17 PF: > { %p1200_p6 = scmp.ge.s32.totalorder %s1540_s13, 1  ;;  %p199_p7 = scmp.lt.s32.totalorder %s1540_s13, 3 }
  0x19   : > { %p200_p8 = pnand %p1200_p6, %p199_p7 }
  0x1a   : > { %s206_s25 = sand.u32 (!%p200_p8), 1, %s1524_s9   ;;  %s244_s26 = smul.u32 (!%p200_p8), 48, %s1532_s11 }
  0x1b   : > { %203 = sbr.rel (%p200_p8) target bundleno = 368 (0x170), region = 50  ;;  %p1202_p10 = scmp.ne.s32.totalorder (!%p200_p8), %s1532_s11, 0 }
  0x1c   : > { %s1354_s27 = smul.u32 (!%p200_p8), 48, %s206_s25  ;;  %p246_p9 = scmp.lt.s32.totalorder (!%p200_p8), %s244_s26, 95 }
  0x1e   : > { %s1611_s4 = scalar_lea.vmem (!%p200_p8), [#allocation3], %s1354_s27 }
  0x22   : > { %s1764_s26 = smov (!%p246_p9, %s244_s26), 95  ;;  %272 = sbr.rel (%p1202_p10) target bundleno = 42 (0x2a), region = 58 }
  0x23   : > { %s1355_s28 = smul.u32 12, %s1764_s26  ;;  %v1542_v8 = vmov (!%p1202_p10), 0.0  }
  0x24   : > { %273 = vst [vmem:[#allocation2] sm:$0xff] (!%p1202_p10), %v1542_v8  ;;  %274 = vst [vmem:[#allocation2 + $0x8] sm:$0xff] (!%p1202_p10), %v1542_v8 }
  0x25   : > { %s1609_s3 = scalar_lea.vmem %s1755_s1, %s1355_s28  ;;  %275 = vst [vmem:[#allocation2 + $0x10] sm:$0xff] (!%p1202_p10), %v1542_v8  ;;  %276 = vst [vmem:[#allocation2 + $0x18] sm:$0xff] (!%p1202_p10), %v1542_v8 }
  0x26   : > { %277 = vst [vmem:[#allocation2 + $0x20] sm:$0xff] (!%p1202_p10), %v1542_v8  ;;  %278 = vst [vmem:[#allocation2 + $0x28] sm:$0xff] (!%p1202_p10), %v1542_v8 }
  0x27   : > { %279 = vst [vmem:[#allocation2 + $0x30] sm:$0xff] (!%p1202_p10), %v1542_v8  ;;  %280 = vst [vmem:[#allocation2 + $0x38] sm:$0xff] (!%p1202_p10), %v1542_v8 }
  0x28   : > { %281 = vst [vmem:[#allocation2 + $0x40] sm:$0xff] (!%p1202_p10), %v1542_v8  ;;  %282 = vst [vmem:[#allocation2 + $0x48] sm:$0xff] (!%p1202_p10), %v1542_v8 }
  0x29   : > { %283 = vst [vmem:[#allocation2 + $0x50] sm:$0xff] %v1542_v8  ;;  %284 = vst [vmem:[#allocation2 + $0x58] sm:$0xff] %v1542_v8 }
  0x2a PF: > { %v1398_v9 = vld [vmem:[%s1609_s3 + $0x4] ss:$12 sps:$4 sm:$0xff]   ;;  %v1543_v11 = vmov 0   ;;  %v1402_v12 = vld [vmem:[%s1609_s3] ss:$12 sps:$4 sm:$0xff]   ;;  %p1281_p11 = scmp.ne.s32.totalorder %s1532_s11, 1 }
  0x2b   : > { %v1400_v10 = vld [vmem:[%s1609_s3 + $0x184] ss:$12 sps:$4 sm:$0xff]   ;;  %902 = vmatprep.mubr.bf16.mxu1 %v1543_v11  ;;  %817 = vmatprep.subr.bf16.mxu0 %v1398_v9  ;;  %v1403_v13 = vld [vmem:[%s1609_s3 + $0x180] ss:$12 sps:$4 sm:$0xff]   ;;  %v1404_v14 = vld [vmem:[%s1609_s3 + $0x1c] ss:$12 sps:$4 sm:$0xff]  }
  0x2c   : > { %870 = vmatprep.subr.bf16.mxu1 %v1400_v10  ;;  %818 = vmatpush1.bf16.msra.mxu0 %v1402_v12  ;;  %v1406_v15 = vld [vmem:[%s1609_s3 + $0x19c] ss:$12 sps:$4 sm:$0xff]   ;;  %v1408_v16 = vld [vmem:[%s1609_s3 + $0x18] ss:$12 sps:$4 sm:$0xff]   ;;  %v1410_v18 = vld [vmem:[%s1609_s3 + $0x34] ss:$12 sps:$4 sm:$0xff]  }
  0x2d   : > { %871 = vmatpush1.bf16.msra.mxu1 %v1403_v13  ;;  %819 = vmatprep.subr.bf16.mxu0 %v1404_v14  ;;  %v1409_v17 = vld [vmem:[%s1609_s3 + $0x198] ss:$12 sps:$4 sm:$0xff]   ;;  %v1412_v19 = vld [vmem:[%s1609_s3 + $0x1b4] ss:$12 sps:$4 sm:$0xff]   ;;  %v1414_v20 = vld [vmem:[%s1609_s3 + $0x30] ss:$12 sps:$4 sm:$0xff]  }
  0x2e   : > { %872 = vmatprep.subr.bf16.mxu1 %v1406_v15  ;;  %v1415_v21 = vld [vmem:[%s1609_s3 + $0x1b0] ss:$12 sps:$4 sm:$0xff]   ;;  %v1416_v22 = vld [vmem:[%s1609_s3 + $0x4c] ss:$12 sps:$4 sm:$0xff]   ;;  %v1420_v24 = vld [vmem:[%s1609_s3 + $0x48] ss:$12 sps:$4 sm:$0xff]  }
  0x2f   : > { %v1418_v23 = vld [vmem:[%s1609_s3 + $0x1cc] ss:$12 sps:$4 sm:$0xff]   ;;  %v1421_v25 = vld [vmem:[%s1609_s3 + $0x1c8] ss:$12 sps:$4 sm:$0xff]   ;;  %v1422_v26 = vld [vmem:[%s1609_s3 + $0x64] ss:$12 sps:$4 sm:$0xff]  }
  0x30   : > { %820 = vmatpush1.bf16.msra.mxu0 %v1408_v16  ;;  %v1424_v27 = vld [vmem:[%s1609_s3 + $0x1e4] ss:$12 sps:$4 sm:$0xff]   ;;  %v1426_v28 = vld [vmem:[%s1609_s3 + $0x60] ss:$12 sps:$4 sm:$0xff]   ;;  %v1428_v30 = vld [vmem:[%s1609_s3 + $0x7c] ss:$12 sps:$4 sm:$0xff]  }
  0x31   : > { %873 = vmatpush1.bf16.msra.mxu1 %v1409_v17  ;;  %821 = vmatprep.subr.bf16.mxu0 %v1410_v18  ;;  %v1427_v29 = vld [vmem:[%s1609_s3 + $0x1e0] ss:$12 sps:$4 sm:$0xff]   ;;  %v1430_v31 = vld [vmem:[%s1609_s3 + $0x1fc] ss:$12 sps:$4 sm:$0xff]   ;;  %v1432_v32 = vld [vmem:[%s1609_s3 + $0x78] ss:$12 sps:$4 sm:$0xff]  }
  0x32   : > { %874 = vmatprep.subr.bf16.mxu1 %v1412_v19  ;;  %v1433_v33 = vld [vmem:[%s1609_s3 + $0x1f8] ss:$12 sps:$4 sm:$0xff]   ;;  %v1434_v34 = vld [vmem:[%s1609_s3 + $0x94] ss:$12 sps:$4 sm:$0xff]   ;;  %v1438_v36 = vld [vmem:[%s1609_s3 + $0x90] ss:$12 sps:$4 sm:$0xff]  }
  0x33   : > { %v1436_v35 = vld [vmem:[%s1609_s3 + $0x214] ss:$12 sps:$4 sm:$0xff]   ;;  %v1439_v37 = vld [vmem:[%s1609_s3 + $0x210] ss:$12 sps:$4 sm:$0xff]   ;;  %v1440_v38 = vld [vmem:[%s1609_s3 + $0xac] ss:$12 sps:$4 sm:$0xff]  }
  0x34   : > { %822 = vmatpush1.bf16.msra.mxu0 %v1414_v20  ;;  %v1442_v39 = vld [vmem:[%s1609_s3 + $0x22c] ss:$12 sps:$4 sm:$0xff]   ;;  %v1444_v40 = vld [vmem:[%s1609_s3 + $0xa8] ss:$12 sps:$4 sm:$0xff]   ;;  %v1446_v42 = vld [vmem:[%s1609_s3 + $0xc4] ss:$12 sps:$4 sm:$0xff]  }
  0x35   : > { %875 = vmatpush1.bf16.msra.mxu1 %v1415_v21  ;;  %823 = vmatprep.subr.bf16.mxu0 %v1416_v22  ;;  %v1445_v41 = vld [vmem:[%s1609_s3 + $0x228] ss:$12 sps:$4 sm:$0xff]   ;;  %v1450_v45 = vld [vmem:[%s1609_s3 + $0xc0] ss:$12 sps:$4 sm:$0xff]   ;;  %v1455_v49 = vld [vmem:[%s1609_s3 + $0xd8] ss:$12 sps:$4 sm:$0xff]  }
  0x36   : > { %876 = vmatprep.subr.bf16.mxu1 %v1418_v23  ;;  %v1649_v43 = vld [vmem:[%s1611_s4 + $0x8] ss:$12 sps:$4 sm:$0xff]   ;;  %v1454_v48 = vld [vmem:[%s1609_s3 + $0xe0] ss:$12 sps:$4 sm:$0xff]   ;;  %v1460_v53 = vld [vmem:[%s1609_s3 + $0xf0] ss:$12 sps:$4 sm:$0xff]  }
  0x37   : > { %v1449_v44 = vld [vmem:[%s1609_s3 + $0xc8] ss:$12 sps:$4 sm:$0xff]   ;;  %v1456_v50 = vld [vmem:[%s1609_s3 + $0x20] ss:$12 sps:$4 sm:$0xff]   ;;  %v1459_v52 = vld [vmem:[%s1609_s3 + $0xf8] ss:$12 sps:$4 sm:$0xff]  }
  0x38   : > { %824 = vmatpush1.bf16.msra.mxu0 %v1420_v24  ;;  %v1451_v46 = vld [vmem:[%s1609_s3 + $0x8] ss:$12 sps:$4 sm:$0xff]   ;;  %v1461_v54 = vld [vmem:[%s1609_s3 + $0x38] ss:$12 sps:$4 sm:$0xff]   ;;  %v1464_v56 = vld [vmem:[%s1609_s3 + $0x110] ss:$12 sps:$4 sm:$0xff]  }
  0x39   : > { %877 = vmatpush1.bf16.msra.mxu1 %v1421_v25  ;;  %825 = vmatprep.subr.bf16.mxu0 %v1422_v26  ;;  %v1452_v47 = vld [vmem:[%s1609_s3 + $0xdc] ss:$12 sps:$4 sm:$0xff]   ;;  %v1457_v51 = vld [vmem:[%s1609_s3 + $0xf4] ss:$12 sps:$4 sm:$0xff]   ;;  %v1462_v55 = vld [vmem:[%s1609_s3 + $0x10c] ss:$12 sps:$4 sm:$0xff]  }
  0x3a   : > { %878 = vmatprep.subr.bf16.mxu1 %v1424_v27  ;;  %v1465_v57 = vld [vmem:[%s1609_s3 + $0x108] ss:$12 sps:$4 sm:$0xff]   ;;  %v1668_v58 = vld [vmem:[%s1611_s4 + $0x20] ss:$12 sps:$4 sm:$0xff]   ;;  %v1475_v2 = vld [vmem:[%s1609_s3 + $0x138] ss:$12 sps:$4 sm:$0xff]  }
  0x3b   : > { %v1466_v59 = vld [vmem:[%s1609_s3 + $0x50] ss:$12 sps:$4 sm:$0xff]   ;;  %v1469_v61 = vld [vmem:[%s1609_s3 + $0x128] ss:$12 sps:$4 sm:$0xff]   ;;  %v1470_v62 = vld [vmem:[%s1609_s3 + $0x120] ss:$12 sps:$4 sm:$0xff]  }
  0x3c   : > { %826 = vmatpush1.bf16.msra.mxu0 %v1426_v28  ;;  %v1467_v60 = vld [vmem:[%s1609_s3 + $0x124] ss:$12 sps:$4 sm:$0xff]   ;;  %v1471_v63 = vld [vmem:[%s1609_s3 + $0x68] ss:$12 sps:$4 sm:$0xff]   ;;  %v1474_v1 = vld [vmem:[%s1609_s3 + $0x140] ss:$12 sps:$4 sm:$0xff]  }
  0x3d   : > { %879 = vmatpush1.bf16.msra.mxu1 %v1427_v29  ;;  %827 = vmatprep.subr.bf16.mxu0 %v1428_v30  ;;  %v1472_v0 = vld [vmem:[%s1609_s3 + $0x13c] ss:$12 sps:$4 sm:$0xff]   ;;  %v1476_v3 = vld [vmem:[%s1609_s3 + $0x80] ss:$12 sps:$4 sm:$0xff]   ;;  %v1480_v6 = vld [vmem:[%s1609_s3 + $0x158] ss:$12 sps:$4 sm:$0xff]  }
  0x3e   : > { %880 = vmatprep.subr.bf16.mxu1 %v1430_v31  ;;  %v1490_v4 = vld [vmem:[%s1611_s4 + $0x4] ss:$12 sps:$4 sm:$0xff]   ;;  %v1483_v9 = vld [vmem:[%s1609_s3 + $0x16c] ss:$12 sps:$4 sm:$0xff]  }
  0x3f   : > { %v1478_v5 = vld [vmem:[%s1609_s3 + $0x154] ss:$12 sps:$4 sm:$0xff]   ;;  %v1481_v7 = vld [vmem:[%s1609_s3 + $0x150] ss:$12 sps:$4 sm:$0xff]   ;;  %849 = vmatprep.mubr.bf16.mxu0 %v1490_v4  ;;  %v1482_v8 = vld [vmem:[%s1609_s3 + $0x98] ss:$12 sps:$4 sm:$0xff]  }
  0x40   : > { %828 = vmatpush1.bf16.msra.mxu0 %v1432_v32  ;;  %v1485_v10 = vld [vmem:[%s1609_s3 + $0x170] ss:$12 sps:$4 sm:$0xff]   ;;  %v1491_v13 = vld [vmem:[%s1609_s3 + $0x188] ss:$12 sps:$4 sm:$0xff]   ;;  %v1492_v16 = vld [vmem:[%s1609_s3 + $0x1a0] ss:$12 sps:$4 sm:$0xff]  }
  0x41   : > { %881 = vmatpush1.bf16.msra.mxu1 %v1433_v33  ;;  %829 = vmatprep.subr.bf16.mxu0 %v1434_v34  ;;  %v1487_v12 = vld [vmem:[%s1609_s3 + $0xb0] ss:$12 sps:$4 sm:$0xff]   ;;  %v1496_v17 = vld [vmem:[%s1609_s3 + $0x1b8] ss:$12 sps:$4 sm:$0xff]   ;;  %v1498_v20 = vld [vmem:[%s1609_s3 + $0x1e8] ss:$12 sps:$4 sm:$0xff]  }
  0x42   : > { %882 = vmatprep.subr.bf16.mxu1 %v1436_v35  ;;  %v1488_v14 = vld [vmem:[%s1611_s4] ss:$12 sps:$4 sm:$0xff]   ;;  %v1493_v15 = vld [vmem:[%s1611_s4 + $0x1c] ss:$12 sps:$4 sm:$0xff]   ;;  %v1495_v18 = vld [vmem:[%s1611_s4 + $0x18] ss:$12 sps:$4 sm:$0xff]  }
  0x43   : > { %v1497_v19 = vld [vmem:[%s1609_s3 + $0x1d0] ss:$12 sps:$4 sm:$0xff]   ;;  %v1499_v21 = vld [vmem:[%s1609_s3 + $0x200] ss:$12 sps:$4 sm:$0xff]   ;;  %v1500_v22 = vld [vmem:[%s1609_s3 + $0x218] ss:$12 sps:$4 sm:$0xff]  }
  0x44   : > { %830 = vmatpush1.bf16.msra.mxu0 %v1438_v36  ;;  %v1501_v23 = vld [vmem:[%s1609_s3 + $0x230] ss:$12 sps:$4 sm:$0xff]   ;;  %v285_v32 = vld [vmem:[#allocation2] sm:$0xff]  ;;  %v286_v36 = vld [vmem:[#allocation2 + $0x8] sm:$0xff] }
  0x45   : > { %883 = vmatpush1.bf16.msra.mxu1 %v1439_v37  ;;  %831 = vmatprep.subr.bf16.mxu0 %v1440_v38 }
  0x46   : > { %884 = vmatprep.subr.bf16.mxu1 %v1442_v39 }
  0x48   : > { %832 = vmatpush1.bf16.msra.mxu0 %v1444_v40 }
  0x49   : > { %885 = vmatpush1.bf16.msra.mxu1 %v1445_v41  ;;  %833 = vmatprep.subr.bf16.mxu0 %v1446_v42  ;;  %v288_v41 = vld [vmem:[#allocation2 + $0x18] sm:$0xff] }
  0x4a   : > { %1287 = vmatprep.subr.bf16.mxu1 %v1449_v44 }
  0x4c   : > { %903 = vmatmul.mubr.bf16.vlgmr.msra.gmra.mrb[0].mxu1 %v1649_v43  ;;  %834 = vmatpush1.bf16.msra.mxu0 %v1450_v45 }
  0x4d   : > { %1288 = vmatpush3.bf16.msra.mxu1 %v1451_v46  ;;  %835 = vmatprep.subr.bf16.mxu0 %v1452_v47  ;;  %v289_v46 = vld [vmem:[#allocation2 + $0x20] sm:$0xff] }
  0x4e   : > { %1289 = vmatprep.subr.bf16.mxu1 %v1454_v48  ;;  %912 = vmatprep.mubr.bf16.mxu1 %v1543_v11  ;;  %v1486_v11 = vld [vmem:[%s1609_s3 + $0x168] ss:$12 sps:$4 sm:$0xff]  }
  0x50   : > { %836 = vmatpush1.bf16.msra.mxu0 %v1455_v49 }
  0x51   : > { %1290 = vmatpush3.bf16.msra.mxu1 %v1456_v50  ;;  %837 = vmatprep.subr.bf16.mxu0 %v1457_v51 }
  0x52   : > { %1291 = vmatprep.subr.bf16.mxu1 %v1459_v52 }
  0x54   : > { %838 = vmatpush1.bf16.msra.mxu0 %v1460_v53  ;;  %913 = vmatmul.mubr.bf16.gmra.mrb[4].mxu1 %v1668_v58 }
  0x55   : > { %1292 = vmatpush3.bf16.msra.mxu1 %v1461_v54  ;;  %839 = vmatprep.subr.bf16.mxu0 %v1462_v55  ;;  %v291_v54 = vld [vmem:[#allocation2 + $0x30] sm:$0xff] }
  0x56   : > { %1293 = vmatprep.subr.bf16.mxu1 %v1464_v56  ;;  %955 = vmatprep.mubr.bf16.mxu1 %v1490_v4  ;;  %v295_v4 = vld [vmem:[#allocation2 + $0x50] sm:$0xff] }
  0x58   : > { %840 = vmatpush1.bf16.msra.mxu0 %v1465_v57 }
  0x59   : > { %1294 = vmatpush3.bf16.msra.mxu1 %v1466_v59  ;;  %841 = vmatprep.subr.bf16.mxu0 %v1467_v60 }
  0x5a   : > { %1295 = vmatprep.subr.bf16.mxu1 %v1469_v61 }
  0x5c   : > { %842 = vmatpush1.bf16.msra.mxu0 %v1470_v62  ;;  %v294_v62 = vld [vmem:[#allocation2 + $0x48] sm:$0xff] }
  0x5d   : > { %1296 = vmatpush3.bf16.msra.mxu1 %v1471_v63  ;;  %843 = vmatprep.subr.bf16.mxu0 %v1472_v0 }
  0x5e   : > { %1297 = vmatprep.subr.bf16.mxu1 %v1474_v1 }
  0x60   : > { %844 = vmatpush1.bf16.msra.mxu0 %v1475_v2 }
  0x61   : > { %1298 = vmatpush3.bf16.msra.mxu1 %v1476_v3  ;;  %845 = vmatprep.subr.bf16.mxu0 %v1478_v5 }
  0x62   : > { %1299 = vmatprep.subr.bf16.mxu1 %v1480_v6 }
  0x64   : > { %846 = vmatpush1.bf16.msra.mxu0 %v1481_v7 }
  0x65   : > { %1300 = vmatpush3.bf16.msra.mxu1 %v1482_v8  ;;  %847 = vmatprep.subr.bf16.mxu0 %v1483_v9 }
  0x66   : > { %1301 = vmatprep.subr.bf16.mxu1 %v1485_v10 }
  0x68   : > { %848 = vmatpush1.bf16.msra.mxu0 %v1486_v11 }
  0x69   : > { %1302 = vmatpush3.bf16.msra.mxu1 %v1487_v12  ;;  %v293_v12 = vld [vmem:[#allocation2 + $0x40] sm:$0xff] }
  0x6a   : > { %1325 = vmatprep.subr.bf16.mxu1 %v1491_v13 }
  0x6b   : > { %850 = vmatmul.mubr.bf16.vlgmr.msra.gmra.mrb[0].mxu0 %v1488_v14 }
  0x6c   : > { %956 = vmatmul.mubr.bf16.vlgmr.msra.gmra.mrb[8].mxu1 %v1488_v14  ;;  %859 = vmatprep.mubr.bf16.mxu0 %v1493_v15 }
  0x6d   : > { %1326 = vmatpush3.bf16.msra.mxu1 %v1491_v13  ;;  %963 = vmatprep.mubr.bf16.mxu1 %v1493_v15  ;;  %v287_v15 = vld [vmem:[#allocation2 + $0x10] sm:$0xff] }
  0x6e   : > { %1327 = vmatprep.subr.bf16.mxu1 %v1492_v16 }
  0x71   : > { %1328 = vmatpush3.bf16.msra.mxu1 %v1492_v16 }
  0x72   : > { %1329 = vmatprep.subr.bf16.mxu1 %v1496_v17 }
  0x73   : > { %860 = vmatmul.mubr.bf16.gmra.mrb[4].mxu0 %v1495_v18 }
  0x74   : > { %964 = vmatmul.mubr.bf16.gmra.mrb[12].mxu1 %v1495_v18  ;;  %v296_v18 = vld [vmem:[#allocation2 + $0x58] sm:$0xff] }
  0x75   : > { %1330 = vmatpush3.bf16.msra.mxu1 %v1496_v17  ;;  %1341 = vmatprep.mubr.bf16.mxu1 %v1649_v43 }
  0x76   : > { %1331 = vmatprep.subr.bf16.mxu1 %v1497_v19 }
  0x79   : > { %1332 = vmatpush3.bf16.msra.mxu1 %v1497_v19 }
  0x7a   : > { %1333 = vmatprep.subr.bf16.mxu1 %v1498_v20 }
  0x7d   : > { %1334 = vmatpush3.bf16.msra.mxu1 %v1498_v20 }
  0x7e   : > { %1335 = vmatprep.subr.bf16.mxu1 %v1499_v21 }
  0x81   : > { %1336 = vmatpush3.bf16.msra.mxu1 %v1499_v21 }
  0x82   : > { %1337 = vmatprep.subr.bf16.mxu1 %v1500_v22 }
  0x85   : > { %1338 = vmatpush3.bf16.msra.mxu1 %v1500_v22  ;;  %v290_v22 = vld [vmem:[#allocation2 + $0x28] sm:$0xff] }
  0x86   : > { %1339 = vmatprep.subr.bf16.mxu1 %v1501_v23 }
  0x89   : > { %1340 = vmatpush3.bf16.msra.mxu1 %v1501_v23 }
  0x8c   : > { %1342 = vmatmul.mubr.bf16.vlgmr.msra.gmra.mrb[16].mxu1 %v1668_v58  ;;  %v292_v58 = vld [vmem:[#allocation2 + $0x38] sm:$0xff] }
 0x11f   : > { %v904_v24 = vpop.f32.mrb[0].mxu1 }
 0x120   : > { %v906_v25 = vpop.f32.mrb[1].mxu1 }
 0x121   : > { %v908_v26 = vpop.f32.mrb[2].mxu1 }
 0x122   : > { %v910_v27 = vpop.f32.mrb[3].mxu1 }
 0x127   : > { %v914_v28 = vpop.f32.mrb[4].mxu1 }
 0x128   : > { %v916_v29 = vpop.f32.mrb[5].mxu1 }
 0x129   : > { %v918_v30 = vpop.f32.mrb[6].mxu1 }
 0x12a   : > { %v920_v31 = vpop.f32.mrb[7].mxu1 }
 0x13e   : > { %v851_v33 = vpop.f32.mrb[0].mxu0 }
 0x13f   : > { %v1303_v34 = vpop.f32.mrb[8].mxu1  ;;  %v905_v35 = vadd.f32 %v904_v24, %v851_v33  ;;  %v853_v37 = vpop.f32.mrb[1].mxu0 }
 0x140   : > { %v1304_v38 = vpop.f32.mrb[9].mxu1  ;;  %v907_v39 = vadd.f32 %v906_v25, %v853_v37  ;;  %v855_v42 = vpop.f32.mrb[2].mxu0 }
 0x141   : > { %v1305_v40 = vadd.f32 %v1304_v38, %v1303_v34  ;;  %v1306_v43 = vpop.f32.mrb[10].mxu1  ;;  %v1021_v44 = vadd.f32 %v905_v35, %v285_v32  ;;  %v909_v45 = vadd.f32 %v908_v26, %v855_v42  ;;  %v857_v47 = vpop.f32.mrb[3].mxu0 }
 0x142   : > { %v1307_v48 = vpop.f32.mrb[11].mxu1  ;;  %v1022_v49 = vadd.f32 %v907_v39, %v286_v36  ;;  %v911_v50 = vadd.f32 %v910_v27, %v857_v47 }
 0x143   : > { %v1308_v51 = vadd.f32 %v1307_v48, %v1306_v43  ;;  %1033 = vst [vmem:[#allocation2] sm:$0xff] %v1021_v44  ;;  %v1024_v52 = vadd.f32 %v909_v45, %v288_v41 }
 0x144   : > { %1034 = vst [vmem:[#allocation2 + $0x8] sm:$0xff] %v1022_v49  ;;  %v1025_v53 = vadd.f32 %v911_v50, %v289_v46 }
 0x145   : > { %1036 = vst [vmem:[#allocation2 + $0x18] sm:$0xff] %v1024_v52 }
 0x146   : > { %1037 = vst [vmem:[#allocation2 + $0x20] sm:$0xff] %v1025_v53  ;;  %v861_v55 = vpop.f32.mrb[4].mxu0 }
 0x147   : > { %v1309_v56 = vpop.f32.mrb[12].mxu1  ;;  %v915_v57 = vadd.f32 %v914_v28, %v861_v55  ;;  %v863_v59 = vpop.f32.mrb[5].mxu0 }
 0x148   : > { %v1310_v60 = vpop.f32.mrb[13].mxu1  ;;  %v917_v61 = vadd.f32 %v916_v29, %v863_v59  ;;  %v865_v63 = vpop.f32.mrb[6].mxu0 }
 0x149   : > { %v1311_v0 = vadd.f32 %v1310_v60, %v1309_v56  ;;  %v1312_v1 = vpop.f32.mrb[14].mxu1  ;;  %v1027_v2 = vadd.f32 %v915_v57, %v291_v54  ;;  %v919_v3 = vadd.f32 %v918_v30, %v865_v63  ;;  %v867_v5 = vpop.f32.mrb[7].mxu0 }
 0x14a   : > { %v1313_v6 = vpop.f32.mrb[15].mxu1  ;;  %v1028_v7 = vadd.f32 %v917_v61, %v292_v58  ;;  %v921_v8 = vadd.f32 %v920_v31, %v867_v5  ;;  %v1049_v28 = vld [vmem:[#allocation2] sm:$0xff] (!%p1281_p11) }
 0x14b   : > { %v1314_v9 = vadd.f32 %v1313_v6, %v1312_v1  ;;  %1039 = vst [vmem:[#allocation2 + $0x30] sm:$0xff] %v1027_v2  ;;  %v1030_v10 = vadd.f32 %v919_v3, %v294_v62  ;;  %v1050_v29 = vld [vmem:[#allocation2 + $0x8] sm:$0xff] (!%p1281_p11)  ;;  %1061 = vst [vmem:[%s1756_s2] sm:$0xff] (!%p1281_p11), %v1049_v28 }
 0x14c   : > { %1040 = vst [vmem:[#allocation2 + $0x38] sm:$0xff] %v1028_v7  ;;  %v1031_v11 = vadd.f32 %v921_v8, %v295_v4  ;;  %1062 = vst [vmem:[%s1756_s2 + $0x8] sm:$0xff] (!%p1281_p11), %v1050_v29  ;;  %v1052_v31 = vld [vmem:[#allocation2 + $0x18] sm:$0xff] (!%p1281_p11) }
 0x14d   : > { %1042 = vst [vmem:[#allocation2 + $0x48] sm:$0xff] %v1030_v10  ;;  %v1053_v32 = vld [vmem:[#allocation2 + $0x20] sm:$0xff] (!%p1281_p11)  ;;  %1064 = vst [vmem:[%s1756_s2 + $0x18] sm:$0xff] (!%p1281_p11), %v1052_v31 }
 0x14e   : > { %1043 = vst [vmem:[#allocation2 + $0x50] sm:$0xff] %v1031_v11  ;;  %1065 = vst [vmem:[%s1756_s2 + $0x20] sm:$0xff] (!%p1281_p11), %v1053_v32 }
 0x152   : > { %v1055_v34 = vld [vmem:[#allocation2 + $0x30] sm:$0xff] (!%p1281_p11) }
 0x153   : > { %v1056_v35 = vld [vmem:[#allocation2 + $0x38] sm:$0xff] (!%p1281_p11)  ;;  %1067 = vst [vmem:[%s1756_s2 + $0x30] sm:$0xff] (!%p1281_p11), %v1055_v34 }
 0x154   : > { %1068 = vst [vmem:[%s1756_s2 + $0x38] sm:$0xff] (!%p1281_p11), %v1056_v35  ;;  %v1058_v37 = vld [vmem:[#allocation2 + $0x48] sm:$0xff] (!%p1281_p11) }
 0x155   : > { %v1059_v38 = vld [vmem:[#allocation2 + $0x50] sm:$0xff] (!%p1281_p11)  ;;  %1070 = vst [vmem:[%s1756_s2 + $0x48] sm:$0xff] (!%p1281_p11), %v1058_v37 }
 0x156   : > { %1071 = vst [vmem:[%s1756_s2 + $0x50] sm:$0xff] (!%p1281_p11), %v1059_v38 }
 0x15f   : > { %v1343_v13 = vpop.f32.mrb[16].mxu1 }
 0x160   : > { %v1015_v14 = vadd.f32 %v1343_v13, %v1311_v0  ;;  %v1006_v16 = vpop.f32.mrb[17].mxu1 }
 0x161   : > { %v1007_v17 = vadd.f32 %v1305_v40, %v1006_v16  ;;  %v1344_v19 = vpop.f32.mrb[18].mxu1  ;;  %1048 = sbr.rel (%p1281_p11) target bundleno = 368 (0x170), region = 62 }
 0x162   : > { %v1029_v20 = vadd.f32 %v1015_v14, %v293_v12  ;;  %v1018_v21 = vadd.f32 %v1344_v19, %v1314_v9  ;;  %v1009_v23 = vpop.f32.mrb[19].mxu1 }
 0x163   : > { %v1023_v24 = vadd.f32 %v1007_v17, %v287_v15  ;;  %v1010_v25 = vadd.f32 %v1308_v51, %v1009_v23 }
 0x164   : > { %1041 = vst [vmem:[#allocation2 + $0x40] sm:$0xff] %v1029_v20  ;;  %v1032_v26 = vadd.f32 %v1018_v21, %v296_v18 }
 0x165   : > { %1035 = vst [vmem:[#allocation2 + $0x10] sm:$0xff] %v1023_v24  ;;  %v1026_v27 = vadd.f32 %v1010_v25, %v290_v22 }
 0x166   : > { %1044 = vst [vmem:[#allocation2 + $0x58] sm:$0xff] %v1032_v26 }
 0x167   : > { %1038 = vst [vmem:[#allocation2 + $0x28] sm:$0xff] %v1026_v27 }
 0x16b   : > { %v1057_v36 = vld [vmem:[#allocation2 + $0x40] sm:$0xff] }
 0x16c   : > { %v1051_v30 = vld [vmem:[#allocation2 + $0x10] sm:$0xff]  ;;  %1069 = vst [vmem:[%s1756_s2 + $0x40] sm:$0xff] %v1057_v36 }
 0x16d   : > { %1063 = vst [vmem:[%s1756_s2 + $0x10] sm:$0xff] %v1051_v30  ;;  %v1060_v39 = vld [vmem:[#allocation2 + $0x58] sm:$0xff] }
 0x16e   : > { %v1054_v33 = vld [vmem:[#allocation2 + $0x28] sm:$0xff]  ;;  %1072 = vst [vmem:[%s1756_s2 + $0x58] sm:$0xff] %v1060_v39 }
 0x16f   : > { %1066 = vst [vmem:[%s1756_s2 + $0x28] sm:$0xff] %v1054_v33 }
 0x170 PF: > { %s12_s13 = sadd.s32 1, %s1540_s13   ;;  %s1757_s9 = smov %s1528_s10 }
 0x171   : > { %p9_p12 = scmp.ge.s32.totalorder %s12_s13, 4   ;;  %s1758_s10 = smov %s1594_s17 }
 0x172   : > { %s1759_s11 = smov %s1536_s12  ;;  %s1760_s12 = smov %s1762_s14 }
 0x173   :  { %11 = sbr.rel (!%p9_p12) target bundleno = 3 (0x3), region = 106 }

</bundles_post_ra>
